<compile_context>
chip_gen: v6e
topology: v6e:2x2x1
jax: 0.10.0
libtpu: 0.0.40
codegen_flags: <defaults>
</compile_context>

<pallas_src>
import jax
import jax.numpy as jnp
from jax import lax
from jax.experimental import pallas as pl
from jax.experimental.pallas import tpu as pltpu


def _pick_block(dim: int, preferred: int, align: int = 128) -> int:
    """Largest multiple of `align` that divides `dim` and is <= preferred.

    Falls back to the full dimension (a block equal to the full array dim
    always satisfies the (8, 128) BlockSpec tiling constraint)."""
    if dim <= preferred:
        return dim
    t = (preferred // align) * align
    while t >= align:
        if dim % t == 0:
            return t
        t -= align
    # TODO(synk): ragged B (no 128-aligned divisor) falls back to a monolithic
    # block; for huge B*D prefer a cdiv grid with in-kernel tail masking.
    return dim


def _loss_kernel(im_ref, s_ref, dcol_ref, drow_ref, out_ref, acc_ref):
    j = pl.program_id(1)

    @pl.when(j == 0)
    def _init():
        acc_ref[...] = jnp.zeros_like(acc_ref)

    # scores[p, q] = <im_p, s_q>; contract last dims of both operands so s is
    # never transposed; MXU accumulates in f32.
    scores = lax.dot_general(
        im_ref[...], s_ref[...],
        dimension_numbers=(((1,), (1,)), ((), ())),
        preferred_element_type=jnp.float32,
    )  # (bm, bn) f32

    d1 = dcol_ref[...]                 # (bm, 1)  diag - margin, this row block
    d2 = drow_ref[...]                 # (1, bn)  diag - margin, this col block

    # Fused epilogue (margin folded into d1/d2): 2 sub + 2 max + 1 add, then
    # one full-tile reduction into the per-row-block scalar accumulator.
    combined = jnp.maximum(scores - d1, 0.0) + jnp.maximum(scores - d2, 0.0)
    acc_ref[...] += jnp.sum(combined, keepdims=True)

    @pl.when(j == pl.num_programs(1) - 1)
    def _finalize():
        # Write the per-row-block partial into element [0, 0] of an aligned
        # (8, 128) output slab (everything else zero), so the wrapper can just
        # jnp.sum() the tiny partials array.  Lane/sublane-aligned stores,
        # and per-i output blocks keep grid axis i "parallel"-safe.
        row = lax.broadcasted_iota(jnp.int32, (8, 128), 0)
        col = lax.broadcasted_iota(jnp.int32, (8, 128), 1)
        val = jnp.broadcast_to(acc_ref[...], (8, 128))
        out_ref[...] = jnp.where((row == 0) & (col == 0), val, 0.0)


def contrastive_loss(im, s, margin: float = 0.0, *, block_m=None, block_n=None,
                     use_bf16_matmul: bool = False):
    """im: (B, D) embeddings, s: (B, D) embeddings. Returns scalar f32 loss."""
    assert im.ndim == 2 and im.shape == s.shape
    B, D = im.shape

    # Diagonal <im_i, s_i> in f32 with margin folded in (XLA fuses this tiny
    # einsum; no separate Pallas prologue, no extra HBM pass over im/s).
    diag = jnp.einsum("bd,bd->b", im.astype(jnp.float32), s.astype(jnp.float32))
    dm = diag - jnp.float32(margin)
    dcol = dm.reshape(B, 1)
    drow = dm.reshape(1, B)

    im_op, s_op = im, s
    if use_bf16_matmul:
        # bf16-native MXU on v6e/v7x; also halves HBM/VMEM traffic.
        im_op = im.astype(jnp.bfloat16)
        s_op = s.astype(jnp.bfloat16)
    itemsize = jnp.dtype(im_op.dtype).itemsize

    # ---- block selection: 128-aligned on both axes; double-buffered im + s
    # working set kept ~<= 24 MiB so it fits v7x's 32 MiB scoped default. ----
    target = 24 << 20
    if block_n is None:
        if 2 * B * D * itemsize <= (12 << 20):
            bn = B                               # keep s fully VMEM-resident
        else:
            bn = _pick_block(B, 512, 128)
    else:
        bn = _pick_block(B, block_n, 128)
    if block_m is None:
        rem = max(target - 2 * bn * D * itemsize, 2 * 128 * D * itemsize)
        bm_pref = max(128, int(rem // (2 * D * itemsize)))
        bm = _pick_block(B, bm_pref, 128)
    else:
        bm = _pick_block(B, block_m, 128)

    num_i = B // bm
    num_j = B // bn

    # Each diagonal entry contributes exactly relu(margin) to each cost term.
    correction = jnp.float32(2.0 * B * max(float(margin), 0.0))

    cost = pl.CostEstimate(
        flops=2 * B * B * D + 6 * B * B,
        bytes_accessed=int((num_j * B * D + num_i * B * D) * itemsize
                           + 2 * B * 4 + num_i * 8 * 128 * 4),
        transcendentals=0,
    )

    # Raise the scoped-VMEM limit only when the working set needs it (leaves
    # small shapes on the conservative per-chip defaults, incl. v5e's 16 MiB).
    need = 2 * (bm + bn) * D * itemsize + 2 * (bm + bn) * 4 + 2 * 8 * 128 * 4
    cp_kwargs = dict(dimension_semantics=("parallel", "arbitrary"))
    if need > (12 << 20):
        cp_kwargs["vmem_limit_bytes"] = int(min(need + (8 << 20), 48 << 20))

    partials = pl.pallas_call(
        _loss_kernel,
        out_shape=jax.ShapeDtypeStruct((num_i * 8, 128), jnp.float32),
        grid_spec=pltpu.PrefetchScalarGridSpec(
            num_scalar_prefetch=0,
            grid=(num_i, num_j),
            in_specs=[
                pl.BlockSpec((bm, D), lambda i, j: (i, 0)),   # im row block
                pl.BlockSpec((bn, D), lambda i, j: (j, 0)),   # s  col block
                pl.BlockSpec((bm, 1), lambda i, j: (i, 0)),   # (diag-m) rows
                pl.BlockSpec((1, bn), lambda i, j: (0, j)),   # (diag-m) cols
            ],
            out_specs=pl.BlockSpec((8, 128), lambda i, j: (i, 0)),
            scratch_shapes=[pltpu.VMEM((1, 1), jnp.float32)],  # per-i running sum
        ),
        compiler_params=pltpu.CompilerParams(**cp_kwargs),
        cost_estimate=cost,
    )(im_op, s_op, dcol, drow)

    return jnp.sum(partials) - correction


def _reference(im, s, margin=0.0):
    scores = im.astype(jnp.float32) @ s.astype(jnp.float32).T
    diag = jnp.diag(scores)[:, None]
    cost_s = jnp.maximum(margin + scores - diag, 0.0)
    cost_im = jnp.maximum(margin + scores - diag.T, 0.0)
    eye = jnp.eye(scores.shape[0], dtype=bool)
    cost_s = jnp.where(eye, 0.0, cost_s)
    cost_im = jnp.where(eye, 0.0, cost_im)
    return jnp.sum(cost_s) + jnp.sum(cost_im)


if __name__ == "__main__":
    key = jax.random.PRNGKey(0)
    k1, k2, k3, k4 = jax.random.split(key, 4)

    # Small config (single monolithic block path).
    B1, D1 = 16, 32
    im1 = jax.random.normal(k1, (B1, D1), dtype=jnp.float32)
    s1 = jax.random.normal(k2, (B1, D1), dtype=jnp.float32)
    for m in (0.0, 0.2):
        loss = contrastive_loss(im1, s1, margin=m)
        jax.block_until_ready(loss)
        ref = _reference(im1, s1, margin=m)
        assert jnp.allclose(loss, ref, rtol=1e-4, atol=1e-3), (m, loss, ref)

    # Tiled 2x2 grid: exercises the "parallel" i axis with per-row-block
    # partial outputs and the j-axis accumulator path.
    B2, D2 = 256, 64
    im2 = jax.random.normal(k3, (B2, D2), dtype=jnp.float32)
    s2 = jax.random.normal(k4, (B2, D2), dtype=jnp.float32)
    loss2 = contrastive_loss(im2, s2, margin=0.0, block_m=128, block_n=128)
    jax.block_until_ready(loss2)
    ref2 = _reference(im2, s2, margin=0.0)
    assert jnp.allclose(loss2, ref2, rtol=1e-4, atol=1e-2), (loss2, ref2)

    # Auto-tiling path (s kept fully VMEM-resident, grid collapses to (1, 1)).
    loss3 = contrastive_loss(im2, s2, margin=0.2)
    jax.block_until_ready(loss3)
    ref3 = _reference(im2, s2, margin=0.2)
    assert jnp.allclose(loss3, ref3, rtol=1e-4, atol=1e-2), (loss3, ref3)

    # bf16 MXU path (v6e/v7x throughput option); sanity execution only.
    loss4 = contrastive_loss(im2, s2, margin=0.0, use_bf16_matmul=True)
    jax.block_until_ready(loss4)

    print("KERNEL_OK")
</pallas_src>

<mosaic_0001>
module attributes {stable_mosaic.version = 11 : i64} {
  func.func @_loss_kernel(%arg0: i32, %arg1: i32, %arg2: memref<16x32xf32, #tpu.memory_space<vmem>>, %arg3: memref<16x32xf32, #tpu.memory_space<vmem>>, %arg4: memref<16x1xf32, #tpu.memory_space<vmem>>, %arg5: memref<1x16xf32, #tpu.memory_space<vmem>>, %arg6: memref<8x128xf32, #tpu.memory_space<vmem>>, %arg7: memref<1x1xf32, #tpu.memory_space<vmem>>) attributes {dimension_semantics = [#tpu.dimension_semantics<parallel>, #tpu.dimension_semantics<arbitrary>], iteration_bounds = array<i64: 1, 1>, scalar_prefetch = 0 : i64, scratch_operands = 1 : i64, tpu.core_type = #tpu.core_type<tc>, window_params = [{transform_indices = @transform_0, window_bounds = array<i64: 16, 32>}, {transform_indices = @transform_1, window_bounds = array<i64: 16, 32>}, {transform_indices = @transform_2, window_bounds = array<i64: 16, 1>}, {transform_indices = @transform_3, window_bounds = array<i64: 1, 16>}, {transform_indices = @transform_4, window_bounds = array<i64: 8, 128>}]} {
    %c0_i32 = arith.constant 0 : i32
    %0 = arith.cmpi eq, %arg1, %c0_i32 : i32
    %1 = arith.extui %0 : i1 to i32
    %c0_i32_0 = arith.constant 0 : i32
    %2 = arith.cmpi ne, %1, %c0_i32_0 : i32
    scf.if %2 {
      %cst_17 = arith.constant 0.000000e+00 : f32
      %28 = vector.broadcast %cst_17 : f32 to vector<1x1xf32>
      %c0_18 = arith.constant 0 : index
      %c0_19 = arith.constant 0 : index
      %29 = vector.load %arg7[%c0_18, %c0_19] : memref<1x1xf32, #tpu.memory_space<vmem>>, vector<1x1xf32>
      tpu.vector_store %arg7[%c0_18, %c0_19], %28 {strides = array<i32>} : memref<1x1xf32, #tpu.memory_space<vmem>>, vector<1x1xf32>,
    } else {
    }
    %c0 = arith.constant 0 : index
    %c0_1 = arith.constant 0 : index
    %3 = vector.load %arg2[%c0, %c0_1] : memref<16x32xf32, #tpu.memory_space<vmem>>, vector<16x32xf32>
    %c0_2 = arith.constant 0 : index
    %c0_3 = arith.constant 0 : index
    %4 = vector.load %arg3[%c0_2, %c0_3] : memref<16x32xf32, #tpu.memory_space<vmem>>, vector<16x32xf32>
    %cst = arith.constant dense<0.000000e+00> : vector<16x16xf32>
    %5 = tpu.matmul %3, %4, %cst {dimension_numbers = #tpu.dot_dimension_numbers<[1], [1], [0], [0], [0, 0, 1, 0], [], []>} : vector<16x32xf32>, vector<16x32xf32>, vector<16x16xf32> -> vector<16x16xf32>
    %c0_4 = arith.constant 0 : index
    %c0_5 = arith.constant 0 : index
    %6 = vector.load %arg4[%c0_4, %c0_5] : memref<16x1xf32, #tpu.memory_space<vmem>>, vector<16x1xf32>
    %c0_6 = arith.constant 0 : index
    %c0_7 = arith.constant 0 : index
    %7 = vector.load %arg5[%c0_6, %c0_7] : memref<1x16xf32, #tpu.memory_space<vmem>>, vector<1x16xf32>
    %8 = vector.broadcast %6 : vector<16x1xf32> to vector<16x16xf32>
    %9 = arith.subf %5, %8 : vector<16x16xf32>
    %cst_8 = arith.constant 0.000000e+00 : f32
    %10 = vector.broadcast %cst_8 : f32 to vector<16x16xf32>
    %11 = arith.maximumf %9, %10 : vector<16x16xf32>
    %12 = vector.broadcast %7 : vector<1x16xf32> to vector<16x16xf32>
    %13 = arith.subf %5, %12 : vector<16x16xf32>
    %cst_9 = arith.constant 0.000000e+00 : f32
    %14 = vector.broadcast %cst_9 : f32 to vector<16x16xf32>
    %15 = arith.maximumf %13, %14 : vector<16x16xf32>
    %16 = arith.addf %11, %15 : vector<16x16xf32>
    %c0_10 = arith.constant 0 : index
    %c0_11 = arith.constant 0 : index
    %17 = vector.load %arg7[%c0_10, %c0_11] : memref<1x1xf32, #tpu.memory_space<vmem>>, vector<1x1xf32>
    %18 = vector.shape_cast %16 : vector<16x16xf32> to vector<1x16x16xf32>
    %cst_12 = arith.constant dense<0.000000e+00> : vector<1xf32>
    %19 = vector.multi_reduction <add>, %18, %cst_12 [1, 2] : vector<1x16x16xf32> to vector<1xf32>
    %20 = vector.shape_cast %19 : vector<1xf32> to vector<1x1x1xf32>
    %21 = vector.extract %20[0, 0, 0] : f32 from vector<1x1x1xf32>
    %22 = vector.broadcast %21 : f32 to vector<1x1xf32>
    %23 = arith.addf %17, %22 : vector<1x1xf32>
    %c0_13 = arith.constant 0 : index
    %c0_14 = arith.constant 0 : index
    %24 = vector.load %arg7[%c0_13, %c0_14] : memref<1x1xf32, #tpu.memory_space<vmem>>, vector<1x1xf32>
    tpu.vector_store %arg7[%c0_13, %c0_14], %23 {strides = array<i32>} : memref<1x1xf32, #tpu.memory_space<vmem>>, vector<1x1xf32>,
    %c0_i32_15 = arith.constant 0 : i32
    %25 = arith.cmpi eq, %arg1, %c0_i32_15 : i32
    %26 = arith.extui %25 : i1 to i32
    %c0_i32_16 = arith.constant 0 : i32
    %27 = arith.cmpi ne, %26, %c0_i32_16 : i32
    scf.if %27 {
      %28 = tpu.iota {dimensions = array<i32: 0>} : vector<8x128xi32>
      %29 = tpu.iota {dimensions = array<i32: 1>} : vector<8x128xi32>
      %c0_17 = arith.constant 0 : index
      %c0_18 = arith.constant 0 : index
      %30 = vector.load %arg7[%c0_17, %c0_18] : memref<1x1xf32, #tpu.memory_space<vmem>>, vector<1x1xf32>
      %31 = vector.shape_cast %30 : vector<1x1xf32> to vector<1x1xf32>
      %32 = vector.broadcast %31 : vector<1x1xf32> to vector<8x128xf32>
      %c0_i32_19 = arith.constant 0 : i32
      %33 = vector.broadcast %c0_i32_19 : i32 to vector<8x128xi32>
      %34 = arith.cmpi eq, %28, %33 : vector<8x128xi32>
      %c0_i32_20 = arith.constant 0 : i32
      %35 = vector.broadcast %c0_i32_20 : i32 to vector<8x128xi32>
      %36 = arith.cmpi eq, %29, %35 : vector<8x128xi32>
      %37 = arith.andi %34, %36 : vector<8x128xi1>
      %cst_21 = arith.constant 0.000000e+00 : f32
      %38 = vector.broadcast %cst_21 : f32 to vector<8x128xf32>
      %39 = arith.select %37, %32, %38 : vector<8x128xi1>, vector<8x128xf32>
      %c0_22 = arith.constant 0 : index
      %c0_23 = arith.constant 0 : index
      %40 = vector.load %arg6[%c0_22, %c0_23] : memref<8x128xf32, #tpu.memory_space<vmem>>, vector<8x128xf32>
      tpu.vector_store %arg6[%c0_22, %c0_23], %39 {strides = array<i32>} : memref<8x128xf32, #tpu.memory_space<vmem>>, vector<8x128xf32>,
    } else {
    }
    return
  }
  func.func @transform_0(%arg0: i32, %arg1: i32) -> (i32, i32) {
    %c0_i32 = arith.constant 0 : i32
    %c0_i32_0 = arith.constant 0 : i32
    return %arg0, %c0_i32 : i32, i32
  }
  func.func @transform_1(%arg0: i32, %arg1: i32) -> (i32, i32) {
    %c0_i32 = arith.constant 0 : i32
    %c0_i32_0 = arith.constant 0 : i32
    return %arg1, %c0_i32 : i32, i32
  }
  func.func @transform_2(%arg0: i32, %arg1: i32) -> (i32, i32) {
    %c0_i32 = arith.constant 0 : i32
    %c0_i32_0 = arith.constant 0 : i32
    return %arg0, %c0_i32 : i32, i32
  }
  func.func @transform_3(%arg0: i32, %arg1: i32) -> (i32, i32) {
    %c0_i32 = arith.constant 0 : i32
    %c0_i32_0 = arith.constant 0 : i32
    return %c0_i32, %arg1 : i32, i32
  }
  func.func @transform_4(%arg0: i32, %arg1: i32) -> (i32, i32) {
    %c0_i32 = arith.constant 0 : i32
    %c0_i32_0 = arith.constant 0 : i32
    return %arg0, %c0_i32 : i32, i32
  }
}

</mosaic_0001>

<bundles_post_ra>
// kernel: tpu_custom_call.1
= control target key start
LH: loop header
LB: loop body
LE: loop exit
PB: predicated region body
PF: predicated region fallthrough
CT: control target
= control target key end

     0   :  { %9 = vsyncpa [#allocation4], 0  ;;  %s337_s0 = inlined_call_operand.vmem [shape: f32[16,32], index: 0, kind: input, shape index: {}]   ;;  %s338_s1 = inlined_call_operand.hbm [shape: f32[16,32], index: 1, kind: input, shape index: {}]   ;;  %s339_s2 = inlined_call_operand.vmem [shape: f32[16,1], index: 2, kind: input, shape index: {}]   ;;  %s340_s3 = inlined_call_operand.vmem [shape: f32[1,16], index: 3, kind: input, shape index: {}]   ;;  %s341_s4 = inlined_call_operand.hbm [shape: f32[8,128], index: 4, kind: output, shape index: {}]  }
   0x1   :  { %10 = vsyncpa [#allocation5], 0  ;;  %s285_s15 = smov [#allocation3]  }
   0x2   :  { %s18_s16 = sshll.u32 %s285_s15, 4  ;;  %s19_s16 = int_to_ptr.vmem [resolvable:$true] %s18_s16 }
   0x3   :  { %s249_s17 = scalar_lea.vmem %s19_s16, 256  ;;  %p254_p1 = scmp.lt.s32.totalorder %s19_s16, %s19_s16 }
   0x4   :  { %p250_p0 = scmp.ne.s32.totalorder %s19_s16, %s249_s17  ;;  %p255_p2 = scmp.lt.s32.totalorder %s249_s17, %s249_s17 }
   0x6   :  { %p256_p3 = por %p255_p2, %p254_p1 }
   0x8   :  { %p257_p4 = pnand %p256_p3, %p250_p0 }
   0xa   :  { %260 = shalt.err (!%p257_p4)
}
   0xb   :  { %s286_s18 = smov 128   ;;  %s287_s19 = smov 8  }
   0xc   :  { %24 = dma.hbm_to_vmem [thread:$0]  %s338_s1, 256, %s19_s16, [#allocation4], %s286_s18, %s286_s18, %s287_s19  }
   0xd   :  { %281 = dma.done.wait [#allocation4], 256  }
   0xe   :  { %282 = vsyncadd [#allocation4], 4294967040  ;;  %v288_v0 = vmov 0   ;;  %vm42_vm0 = vcmask 261120   ;;  %v41_v1 = vld [vmem:[#allocation3 + $0x8] sm:$0xff]  ;;  %v40_v2 = vld [vmem:[#allocation3] sm:$0xff]  ;;  %v180_v37 = vlaneseq }
   0xf   :  { %239 = vset.pattern.permute.xlu0 %v288_v0  ;;  %240 = vset.pattern.permute.xlu1 %v288_v0  ;;  %v38_v3 = vld [vmem:[%s337_s0] sm:$0xff]  ;;  %v131_v5 = vld [vmem:[%s339_s2 + $0x8] sm:$0xff]  ;;  %vm160_vm1 = vcmask 130048   ;;  %vm36_vm2 = vcmask 0   ;;  %v289_v25 = vmov 0.0  }
  0x10   :  { %224 = vmatprep.subr.msk.mxu0 %vm42_vm0, %v41_v1  ;;  %228 = vmatprep.mubr.msk.f32.mxu0 %vm42_vm0, %v38_v3  ;;  %v130_v4 = vld [vmem:[%s339_s2] sm:$0xff]  ;;  %v39_v6 = vld [vmem:[%s337_s0 + $0x8] sm:$0xff]  ;;  %37 = vst.msk [vmem:[#allocation2] sm:$0x1] %vm36_vm2, %v289_v25  ;;  %v181_v38 = vshrl.u32 %v180_v37, 7  ;;  %v183_v39 = vand.u32 127, %v180_v37 }
  0x11   :  { %225 = vmatpush3.xpose.msk.msra.mxu0 %vm42_vm0, %v41_v1  ;;  %135 = vperm.xlu0 %239, %v130_v4   ;;  %v218_v8 = vld [vmem:[%s340_s3] ss:$0 sm:$0xff]  ;;  %s290_s2 = smov [#allocation6]  }
  0x12   :  { %226 = vmatprep.subr.msk.mxu0 %vm42_vm0, %v40_v2  ;;  %vm194_vm3 = vcmp.eq.s32.totalorder %v181_v38, 0  ;;  %vm195_vm4 = vcmp.eq.s32.totalorder %v183_v39, 0  ;;  %s205_s3 = sshll.u32 %s290_s2, 4  ;;  %s206_s3 = int_to_ptr.vmem [resolvable:$true] %s205_s3 }
  0x13   :  { %vm196_vm5 = vmand %vm194_vm3, %vm195_vm4  ;;  %s261_s5 = scalar_lea.vmem %s206_s3, 128  ;;  %p266_p6 = scmp.lt.s32.totalorder %s206_s3, %s206_s3 }
  0x14   :  { %p262_p5 = scmp.ne.s32.totalorder %s206_s3, %s261_s5  ;;  %p267_p7 = scmp.lt.s32.totalorder %s261_s5, %s261_s5 }
  0x15   :  { %227 = vmatpush3.xpose.msk.msra.mxu0 %vm42_vm0, %v40_v2  ;;  %140 = vperm.xlu0 %239, %v131_v5  }
  0x16   :  { %p268_p8 = por %p267_p7, %p266_p6 }
  0x17   :  { %v159_v33 = vld [vmem:[#allocation2] sm:$0x1] }
  0x18   :  { %229 = vmatmul.mubr.msk.f32.vlgmr.msra.gmra.mxu0 %vm42_vm0, %v39_v6  ;;  %p269_p9 = pnand %p268_p8, %p262_p5 }
  0x8c   :  { %v136_v7 = vpop.permute.xlu0 %135 }
  0x90   :  { %v141_v9 = vpop.permute.xlu0 %140 }
  0xd8   :  { %v230_v10 = vpop.f32.mrf.mxu0 }
  0xd9   :  { %v144_v11 = vsub.f32 %v230_v10, %v141_v9  ;;  %v154_v12 = vsub.f32 %v230_v10, %v218_v8 }
  0xda   :  { %v121_v13 = vpop.f32.mrf.mxu0 }
  0xdb   :  { %v146_v14 = vmax.f32 %v144_v11, 0.0  ;;  %v143_v15 = vsub.f32 %v121_v13, %v136_v7  ;;  %v153_v16 = vsub.f32 %v121_v13, %v218_v8  ;;  %v156_v17 = vmax.f32 %v154_v12, 0.0 }
  0xdd   :  { %v145_v18 = vmax.f32 %v143_v15, 0.0  ;;  %v155_v19 = vmax.f32 %v153_v16, 0.0  ;;  %v158_v20 = vadd.f32 %v156_v17, %v146_v14 }
  0xdf   :  { %v157_v21 = vadd.f32 %v155_v19, %v145_v18  ;;  %v162_v23 = vsel %vm160_vm1, %v158_v20, 0.0 }
  0xe1   :  { %v161_v22 = vsel %vm160_vm1, %v157_v21, 0.0 }
  0xe2   :  { %v163_v24 = vadd.f32 %v162_v23, %v161_v22 }
  0xe4   :  { %164 = vadd.xlane.f32.xlu1 %v163_v24 }
 0x16d   :  { %v165_v26 = vpop.xlane.xlu1 %164 }
 0x16e   :  { %v166_v27 = vrot.slane %v165_v26, 4 }
 0x170   :  { %v167_v28 = vadd.f32 %v166_v27, %v165_v26 }
 0x172   :  { %v168_v29 = vrot.slane %v167_v28, 2 }
 0x174   :  { %v169_v30 = vadd.f32 %v168_v29, %v167_v28 }
 0x176   :  { %v170_v31 = vrot.slane %v169_v30, 1 }
 0x178   :  { %v171_v32 = vadd.f32 %v170_v31, %v169_v30 }
 0x17a   :  { %231 = vpush %v171_v32 }
 0x1ab   :  { %s232_s0 = spop %231 }
 0x1ac   :  { %v173_v34 = vstv %s232_s0 }
 0x1ad   :  { %v174_v35 = vadd.f32 %v173_v34, %v159_v33 }
 0x1af   :  { %176 = vst.msk [vmem:[#allocation2] sm:$0x1] %vm36_vm2, %v174_v35 }
 0x1b6   :  { %v219_v36 = vld [vmem:[#allocation2] ss:$0 sm:$0xff] }
 0x1b7   :  { %191 = vperm.xlu1 %240, %v219_v36  }
 0x232   :  { %v192_v40 = vpop.permute.xlu1 %191 }
 0x233   :  { %v197_v41 = vsel %vm196_vm5, %v192_v40, 0.0 }
 0x234   :  { %198 = vst [vmem:[#allocation6] sm:$0xff] %v197_v41 }
 0x235   :  { %272 = shalt.err (!%p269_p9)
}
 0x236   :  { %208 = dma.vmem_to_hbm [thread:$0]  %s206_s3, 128, %s341_s4, [#allocation5]  }
 0x237   :  { %283 = dma.done.wait [#allocation5], 128  }
 0x238   :  { %284 = vsyncadd [#allocation5], 4294967168 }
 0x239   :  { %212 = vsyncpa [#allocation4], 1 }
 0x23a   :  { %213 = vsyncpa [#allocation5], 1 }

</bundles_post_ra>
